<compile_context>
chip_gen: v7x
topology: tpu7x:2x2x1
jax: 0.10.0
libtpu: 0.0.40
codegen_flags: <defaults>
</compile_context>

<pallas_src>
import math

import jax
import jax.numpy as jnp
from jax.experimental import pallas as pl
from jax.experimental.pallas import tpu as pltpu

_LN2 = math.log(2.0)


def _round_up(x: int, m: int) -> int:
    return ((x + m - 1) // m) * m


def _rbm_kernel(a_ref, b_ref, wt_ref, vt_ref, out_ref, acc_ref):
    # a_ref  : (Vp, 1)   visible bias, column layout
    # b_ref  : (TH, 1)   hidden-bias tile, column layout
    # wt_ref : (TH, Vp)  W^T tile
    # vt_ref : (Vp, TB)  spin configurations, batch on the lane axis
    # out_ref: (1, TB)   lane-dense per-sample log-amplitudes
    # acc_ref: (1, TB)   VMEM accumulator across the H-reduction grid axis
    j = pl.program_id(1)

    vt = vt_ref[...]                                            # (Vp, TB)

    @pl.when(j == 0)
    def _():
        # linear term: a . v per sample  -> (1, TB)
        acc_ref[...] = jnp.sum(a_ref[...] * vt, axis=0, keepdims=True)

    # activation tile: W^T v + b  -> (TH, TB), batch stays on lanes (MXU).
    act = jnp.dot(wt_ref[...], vt, preferred_element_type=jnp.float32)
    act = act + b_ref[...]

    # log(2*cosh(x)) == |x| + log(1 + exp(-2|x|))  (overflow-safe, cheaper).
    abs_act = jnp.abs(act)
    hidden = abs_act + jnp.log(1.0 + jnp.exp(-2.0 * abs_act))
    acc_ref[...] += jnp.sum(hidden, axis=0, keepdims=True)

    @pl.when(j == pl.num_programs(1) - 1)
    def _():
        out_ref[...] = acc_ref[...]


def rbm_forward_batched(a, b, W, v_batch, *, batch_tile=256, hidden_tile=512):
    """log psi for a batch of configurations.

    a: (V,), b: (H,), W: (V, H), v_batch: (B, V) with values +-1.
    Returns (B,) float32.
    """
    V, H = W.shape
    v_batch = jnp.atleast_2d(v_batch)
    B = v_batch.shape[0]
    f32 = jnp.float32

    # Padding: V -> multiple of 8 (zeros are exact no-ops for both terms),
    # H -> multiple of the H tile (each zero-padded hidden unit contributes
    # exactly ln 2, corrected below), B -> multiple of the lane-dense tile.
    Vp = _round_up(V, 8)
    TH = min(hidden_tile, _round_up(H, 8))
    Hp = _round_up(H, TH)
    TB = batch_tile
    Bp = _round_up(B, TB)

    a_col = jnp.zeros((Vp, 1), f32).at[:V, 0].set(a.astype(f32))
    b_col = jnp.zeros((Hp, 1), f32).at[:H, 0].set(b.astype(f32))
    w_t = jnp.zeros((Hp, Vp), f32).at[:H, :V].set(W.T.astype(f32))
    v_t = jnp.zeros((Vp, Bp), f32).at[:V, :B].set(v_batch.T.astype(f32))

    nb = Bp // TB
    nh = Hp // TH

    out = pl.pallas_call(
        _rbm_kernel,
        out_shape=jax.ShapeDtypeStruct((1, Bp), f32),
        grid_spec=pltpu.PrefetchScalarGridSpec(
            num_scalar_prefetch=0,
            grid=(nb, nh),                       # batch outer, H-reduction last
            in_specs=[
                pl.BlockSpec((Vp, 1), lambda i, j: (0, 0)),    # a  (column)
                pl.BlockSpec((TH, 1), lambda i, j: (j, 0)),    # b  tile
                pl.BlockSpec((TH, Vp), lambda i, j: (j, 0)),   # W^T tile
                pl.BlockSpec((Vp, TB), lambda i, j: (0, i)),   # v^T tile
            ],
            out_specs=pl.BlockSpec((1, TB), lambda i, j: (0, i)),
            scratch_shapes=[pltpu.VMEM((1, TB), f32)],
        ),
        compiler_params=pltpu.CompilerParams(
            dimension_semantics=("parallel", "arbitrary"),
            vmem_limit_bytes=48 * 1024 * 1024,   # headroom on v7x (64 MiB phys)
        ),
    )(a_col, b_col, w_t, v_t)

    out = out[0, :B]
    # Each zero-padded hidden unit (zero W column, zero bias) added exactly ln 2.
    return out - (Hp - H) * _LN2


def rbm_forward(a, b, W, v):
    """log psi(v) for a single configuration v of shape (V,). Returns scalar."""
    return rbm_forward_batched(a, b, W, v.reshape(1, -1))[0]


def rbm_psi(a, b, W, v):
    """Wave-function amplitude psi(v) = exp(forward(v))."""
    return jnp.exp(rbm_forward(a, b, W, v))


if __name__ == "__main__":
    num_visible = 16
    num_hidden = 32
    batch = 8

    key = jax.random.PRNGKey(0)
    k_w, k_a, k_b, k_v = jax.random.split(key, 4)

    # Parameters (module inits a, b to zero; use small random values here so
    # both the linear and hidden terms are exercised).
    a = 0.05 * jax.random.normal(k_a, (num_visible,), dtype=jnp.float32)
    b = 0.05 * jax.random.normal(k_b, (num_hidden,), dtype=jnp.float32)
    W = 0.01 * jax.random.normal(k_w, (num_visible, num_hidden), dtype=jnp.float32)

    # Spin configurations with values +-1.
    v_batch = jnp.where(
        jax.random.bernoulli(k_v, 0.5, (batch, num_visible)), 1.0, -1.0
    ).astype(jnp.float32)

    out = rbm_forward_batched(a, b, W, v_batch)
    out = jax.block_until_ready(out)

    # Pure-JAX reference (float32).
    act = v_batch @ W + b[None, :]
    ref = v_batch @ a + jnp.sum(jnp.log(2.0 * jnp.cosh(act)), axis=-1)
    assert out.shape == (batch,), out.shape
    assert jnp.allclose(out, ref, rtol=1e-5, atol=1e-5), (out, ref)

    # Single-configuration path (matches RBM.forward / RBM.psi signatures).
    single = rbm_forward(a, b, W, v_batch[0])
    jax.block_until_ready(single)
    assert jnp.allclose(single, ref[0], rtol=1e-5, atol=1e-5), (single, ref[0])
    psi = rbm_psi(a, b, W, v_batch[0])
    jax.block_until_ready(psi)
    assert jnp.allclose(psi, jnp.exp(ref[0]), rtol=1e-4, atol=1e-5), (psi, ref[0])

    print("KERNEL_OK")
</pallas_src>

<mosaic_0001>
module attributes {stable_mosaic.version = 11 : i64} {
  func.func @_rbm_kernel(%arg0: i32, %arg1: i32, %arg2: memref<16x1xf32, #tpu.memory_space<vmem>>, %arg3: memref<32x1xf32, #tpu.memory_space<vmem>>, %arg4: memref<32x16xf32, #tpu.memory_space<vmem>>, %arg5: memref<16x256xf32, #tpu.memory_space<vmem>>, %arg6: memref<1x256xf32, #tpu.memory_space<vmem>>, %arg7: memref<1x256xf32, #tpu.memory_space<vmem>>) attributes {dimension_semantics = [#tpu.dimension_semantics<parallel>, #tpu.dimension_semantics<arbitrary>], iteration_bounds = array<i64: 1, 1>, scalar_prefetch = 0 : i64, scratch_operands = 1 : i64, tpu.core_type = #tpu.core_type<tc>, window_params = [{pipeline_mode = #tpu.pipeline_mode<synchronous>, transform_indices = @transform_0, window_bounds = array<i64: 16, 1>}, {transform_indices = @transform_1, window_bounds = array<i64: 32, 1>}, {transform_indices = @transform_2, window_bounds = array<i64: 32, 16>}, {transform_indices = @transform_3, window_bounds = array<i64: 16, 256>}, {transform_indices = @transform_4, window_bounds = array<i64: 1, 256>}]} {
    %c0 = arith.constant 0 : index
    %c0_0 = arith.constant 0 : index
    %0 = vector.load %arg5[%c0, %c0_0] : memref<16x256xf32, #tpu.memory_space<vmem>>, vector<16x256xf32>
    %c0_i32 = arith.constant 0 : i32
    %1 = arith.cmpi eq, %arg1, %c0_i32 : i32
    %2 = arith.extui %1 : i1 to i32
    %c0_i32_1 = arith.constant 0 : i32
    %3 = arith.cmpi ne, %2, %c0_i32_1 : i32
    scf.if %3 {
      %c0_15 = arith.constant 0 : index
      %c0_16 = arith.constant 0 : index
      %25 = vector.load %arg2[%c0_15, %c0_16] : memref<16x1xf32, #tpu.memory_space<vmem>>, vector<16x1xf32>
      %26 = vector.broadcast %25 : vector<16x1xf32> to vector<16x256xf32>
      %27 = arith.mulf %26, %0 : vector<16x256xf32>
      %cst_17 = arith.constant dense<0.000000e+00> : vector<256xf32>
      %28 = vector.multi_reduction <add>, %27, %cst_17 [0] : vector<16x256xf32> to vector<256xf32>
      %29 = vector.shape_cast %28 : vector<256xf32> to vector<1x256xf32>
      %c0_18 = arith.constant 0 : index
      %c0_19 = arith.constant 0 : index
      %30 = vector.load %arg7[%c0_18, %c0_19] : memref<1x256xf32, #tpu.memory_space<vmem>>, vector<1x256xf32>
      tpu.vector_store %arg7[%c0_18, %c0_19], %29 {strides = array<i32>} : memref<1x256xf32, #tpu.memory_space<vmem>>, vector<1x256xf32>,
    } else {
    }
    %c0_2 = arith.constant 0 : index
    %c0_3 = arith.constant 0 : index
    %4 = vector.load %arg4[%c0_2, %c0_3] : memref<32x16xf32, #tpu.memory_space<vmem>>, vector<32x16xf32>
    %cst = arith.constant dense<0.000000e+00> : vector<32x256xf32>
    %5 = tpu.matmul %4, %0, %cst {dimension_numbers = #tpu.dot_dimension_numbers<[1], [0], [0], [1], [0, 0, 1, 1], [], []>} : vector<32x16xf32>, vector<16x256xf32>, vector<32x256xf32> -> vector<32x256xf32>
    %c0_4 = arith.constant 0 : index
    %c0_5 = arith.constant 0 : index
    %6 = vector.load %arg3[%c0_4, %c0_5] : memref<32x1xf32, #tpu.memory_space<vmem>>, vector<32x1xf32>
    %7 = vector.broadcast %6 : vector<32x1xf32> to vector<32x256xf32>
    %8 = arith.addf %5, %7 : vector<32x256xf32>
    %9 = math.absf %8 : vector<32x256xf32>
    %cst_6 = arith.constant -2.000000e+00 : f32
    %10 = vector.broadcast %cst_6 : f32 to vector<32x256xf32>
    %11 = arith.mulf %10, %9 : vector<32x256xf32>
    %12 = math.exp %11 : vector<32x256xf32>
    %cst_7 = arith.constant 1.000000e+00 : f32
    %13 = vector.broadcast %cst_7 : f32 to vector<32x256xf32>
    %14 = arith.addf %13, %12 : vector<32x256xf32>
    %15 = math.log %14 : vector<32x256xf32>
    %16 = arith.addf %9, %15 : vector<32x256xf32>
    %c0_8 = arith.constant 0 : index
    %c0_9 = arith.constant 0 : index
    %17 = vector.load %arg7[%c0_8, %c0_9] : memref<1x256xf32, #tpu.memory_space<vmem>>, vector<1x256xf32>
    %cst_10 = arith.constant dense<0.000000e+00> : vector<256xf32>
    %18 = vector.multi_reduction <add>, %16, %cst_10 [0] : vector<32x256xf32> to vector<256xf32>
    %19 = vector.shape_cast %18 : vector<256xf32> to vector<1x256xf32>
    %20 = arith.addf %17, %19 : vector<1x256xf32>
    %c0_11 = arith.constant 0 : index
    %c0_12 = arith.constant 0 : index
    %21 = vector.load %arg7[%c0_11, %c0_12] : memref<1x256xf32, #tpu.memory_space<vmem>>, vector<1x256xf32>
    tpu.vector_store %arg7[%c0_11, %c0_12], %20 {strides = array<i32>} : memref<1x256xf32, #tpu.memory_space<vmem>>, vector<1x256xf32>,
    %c0_i32_13 = arith.constant 0 : i32
    %22 = arith.cmpi eq, %arg1, %c0_i32_13 : i32
    %23 = arith.extui %22 : i1 to i32
    %c0_i32_14 = arith.constant 0 : i32
    %24 = arith.cmpi ne, %23, %c0_i32_14 : i32
    scf.if %24 {
      %c0_15 = arith.constant 0 : index
      %c0_16 = arith.constant 0 : index
      %25 = vector.load %arg7[%c0_15, %c0_16] : memref<1x256xf32, #tpu.memory_space<vmem>>, vector<1x256xf32>
      %c0_17 = arith.constant 0 : index
      %c0_18 = arith.constant 0 : index
      %26 = vector.load %arg6[%c0_17, %c0_18] : memref<1x256xf32, #tpu.memory_space<vmem>>, vector<1x256xf32>
      tpu.vector_store %arg6[%c0_17, %c0_18], %25 {strides = array<i32>} : memref<1x256xf32, #tpu.memory_space<vmem>>, vector<1x256xf32>,
    } else {
    }
    return
  }
  func.func @transform_0(%arg0: i32, %arg1: i32) -> (i32, i32) {
    %c0_i32 = arith.constant 0 : i32
    %c0_i32_0 = arith.constant 0 : i32
    %c0_i32_1 = arith.constant 0 : i32
    return %c0_i32, %c0_i32_0 : i32, i32
  }
  func.func @transform_1(%arg0: i32, %arg1: i32) -> (i32, i32) {
    %c0_i32 = arith.constant 0 : i32
    %c0_i32_0 = arith.constant 0 : i32
    return %arg1, %c0_i32 : i32, i32
  }
  func.func @transform_2(%arg0: i32, %arg1: i32) -> (i32, i32) {
    %c0_i32 = arith.constant 0 : i32
    %c0_i32_0 = arith.constant 0 : i32
    return %arg1, %c0_i32 : i32, i32
  }
  func.func @transform_3(%arg0: i32, %arg1: i32) -> (i32, i32) {
    %c0_i32 = arith.constant 0 : i32
    %c0_i32_0 = arith.constant 0 : i32
    return %c0_i32, %arg0 : i32, i32
  }
  func.func @transform_4(%arg0: i32, %arg1: i32) -> (i32, i32) {
    %c0_i32 = arith.constant 0 : i32
    %c0_i32_0 = arith.constant 0 : i32
    return %c0_i32, %arg0 : i32, i32
  }
}

</mosaic_0001>

<bundles_post_ra>
// kernel: tpu_custom_call.1
= control target key start
LH: loop header
LB: loop body
LE: loop exit
PB: predicated region body
PF: predicated region fallthrough
CT: control target
= control target key end

     0   :  { %v407_v5 = vmov 0.0   ;;  %v408_v7 = vmov 0   ;;  %vm107_vm0 = vcmask 130048   ;;  %s558_s0 = inlined_call_operand.vmem [shape: f32[16,1], index: 0, kind: input, shape index: {}]   ;;  %s559_s1 = inlined_call_operand.vmem [shape: f32[32,1], index: 1, kind: input, shape index: {}]   ;;  %s560_s2 = inlined_call_operand.vmem [shape: f32[32,16], index: 2, kind: input, shape index: {}]   ;;  %s561_s3 = inlined_call_operand.vmem [shape: f32[16,256], index: 3, kind: input, shape index: {}]   ;;  %s562_s4 = inlined_call_operand.hbm [shape: f32[1,256], index: 4, kind: output, shape index: {}]  }
   0x1   :  { %v19_v0 = vld [vmem:[%s561_s3 + $0x8] sm:$0xff]  ;;  %v21_v1 = vld [vmem:[%s561_s3 + $0x18] sm:$0xff]  ;;  %v18_v2 = vld [vmem:[%s561_s3] sm:$0xff]  ;;  %184 = vmatprep.mubr.f32.mxu0 %v407_v5  ;;  %196 = vmatprep.mubr.f32.mxu1 %v407_v5 }
   0x2   :  { %v339_v3 = vpack.c.bf16 %v21_v1, %v19_v0  ;;  %v20_v4 = vld [vmem:[%s561_s3 + $0x10] sm:$0xff]  ;;  %350 = vset.pattern.permute.xlu1 %v408_v7  ;;  %349 = vset.pattern.permute.xlu0 %v408_v7  ;;  %v83_v9 = vld [vmem:[%s559_s1] sm:$0xff] }
   0x3   :  { %v341_v6 = vpack.c.bf16 %v20_v4, %v18_v2  ;;  %v85_v8 = vld [vmem:[%s559_s1 + $0x10] sm:$0xff]  ;;  %v79_v10 = vld [vmem:[%s560_s2] sm:$0xff] }
   0x4   :  { %340 = vmatprep.subr.bf16.mxu0 %v339_v3  ;;  %343 = vmatprep.subr.bf16.mxu1 %v339_v3  ;;  %v81_v11 = vld [vmem:[%s560_s2 + $0x10] sm:$0xff] }
   0x5   :  { %342 = vmatpush1.bf16.msra.mxu0 %v341_v6  ;;  %344 = vmatpush1.bf16.msra.mxu1 %v341_v6 }
   0x6   :  { %9 = vsyncpa [#allocation4], 0  ;;  %99 = vperm.xlu1 %350, %v85_v8   ;;  %89 = vperm.xlu0 %349, %v83_v9   ;;  %v86_v12 = vld [vmem:[%s559_s1 + $0x18] sm:$0xff]  ;;  %v84_v13 = vld [vmem:[%s559_s1 + $0x8] sm:$0xff]  ;;  %v409_v34 = vmov 1966171168   ;;  %v62_v36 = vlaneseq }
   0x7   :  { %v80_v14 = vld [vmem:[%s560_s2 + $0x8] sm:$0xff]  ;;  %v82_v15 = vld [vmem:[%s560_s2 + $0x18] sm:$0xff]  ;;  %v26_v17 = vld [vmem:[%s558_s0] sm:$0xff]  ;;  %v60_v35 = vunpack.c.l.s4 %v409_v34 }
   0x8   :  { %335 = vmatmul.mubr.msk.f32.vlgmr.msra.gmra.mrb[0].mxu0 %vm107_vm0, %v79_v10  ;;  %337 = vmatmul.mubr.msk.f32.vlgmr.msra.gmra.mrb[0].mxu1 %vm107_vm0, %v81_v11  ;;  %v27_v16 = vld [vmem:[%s558_s0 + $0x8] sm:$0xff]  ;;  %v63_v42 = vshrl.u32 %v62_v36, 7  ;;  %vm485_vm1 = vcmp.lt.s32.totalorder %v62_v36, 256  ;;  %s410_s0 = smov [#allocation3]  }
   0x9   :  { %190 = vmatprep.mubr.f32.mxu0 %v407_v5  ;;  %202 = vmatprep.mubr.f32.mxu1 %v407_v5  ;;  %v61_v41 = vunpack.c.0.s8 %v60_v35  ;;  %s327_s2 = sshll.u32 %s410_s0, 4  ;;  %s328_s2 = int_to_ptr.vmem [resolvable:$true] %s327_s2 }
   0xa   :  { %104 = vperm.xlu1 %350, %v86_v12   ;;  %94 = vperm.xlu0 %349, %v84_v13   ;;  %s383_s15 = scalar_lea.vmem %s328_s2, 32  ;;  %p388_p1 = scmp.lt.s32.totalorder %s328_s2, %s328_s2 }
   0xb   :  { %v482_v47 = vsub.s32 %v61_v41, %v63_v42  ;;  %p384_p0 = scmp.ne.s32.totalorder %s328_s2, %s383_s15  ;;  %p389_p2 = scmp.lt.s32.totalorder %s383_s15, %s383_s15 }
   0xc   :  { %336 = vmatmul.mubr.msk.f32.gmra.mrb[2].mxu0 %vm107_vm0, %v80_v14  ;;  %338 = vmatmul.mubr.msk.f32.gmra.mrb[2].mxu1 %vm107_vm0, %v82_v15 }
   0xd   :  { %p390_p3 = por %p389_p2, %p388_p1 }
   0xe   :  { %35 = vperm.xlu1 %350, %v27_v16   ;;  %30 = vperm.xlu0 %349, %v26_v17  }
   0xf   :  { %p391_p4 = pnand %p390_p3, %p384_p0 }
  0x85   :  { %v100_v18 = vpop.permute.xlu1 %99  ;;  %v90_v19 = vpop.permute.xlu0 %89 }
  0x89   :  { %v105_v20 = vpop.permute.xlu1 %104  ;;  %v95_v21 = vpop.permute.xlu0 %94 }
  0x8d   :  { %v36_v22 = vpop.permute.xlu1 %35  ;;  %v31_v23 = vpop.permute.xlu0 %30 }
  0x8e   :  { %v40_v24 = vmul.f32 %v36_v22, %v20_v4  ;;  %v41_v25 = vmul.f32 %v36_v22, %v21_v1  ;;  %v38_v26 = vmul.f32 %v31_v23, %v18_v2  ;;  %v39_v27 = vmul.f32 %v31_v23, %v19_v0 }
  0x90   :  { %v42_v28 = vadd.f32 %v40_v24, %v38_v26  ;;  %v49_v29 = vadd.f32 %v41_v25, %v39_v27 }
  0x92   :  { %v43_v30 = vrot.slane %v42_v28, 4  ;;  %v50_v31 = vrot.slane %v49_v29, 4 }
  0x94   :  { %v44_v32 = vadd.f32 %v43_v30, %v42_v28  ;;  %v51_v33 = vadd.f32 %v50_v31, %v49_v29 }
  0x96   :  { %v45_v37 = vrot.slane %v44_v32, 2  ;;  %v52_v38 = vrot.slane %v51_v33, 2 }
  0x98   :  { %v46_v39 = vadd.f32 %v45_v37, %v44_v32  ;;  %v53_v40 = vadd.f32 %v52_v38, %v51_v33 }
  0x9a   :  { %v47_v43 = vrot.slane %v46_v39, 1  ;;  %v54_v44 = vrot.slane %v53_v40, 1 }
  0x9c   :  { %v48_v45 = vadd.f32 %v47_v43, %v46_v39  ;;  %v55_v46 = vadd.f32 %v54_v44, %v53_v40 }
  0x9e   :  { %v58_v48 = vcombine.low %v48_v45, %v55_v46 }
  0xa0   :  { %v65_v49 = vrot.slane %v58_v48, %v482_v47 }
  0xa2   :  { %v72_v51 = vrot.slane %v65_v49, %v482_v47 }
  0xa4   :  { %78 = vst.msk [vmem:[#allocation2] sm:$0x3] %vm485_vm1, %v72_v51 }
  0xdb   :  { %v186_v52 = vpop.f32.mrb[0].mxu0  ;;  %v198_v53 = vpop.f32.mrb[0].mxu1 }
  0xdc   :  { %v492_v54 = vadd.f32 %v186_v52, %v90_v19  ;;  %v494_v55 = vadd.f32 %v198_v53, %v100_v18  ;;  %v188_v56 = vpop.f32.mrb[1].mxu0  ;;  %v200_v57 = vpop.f32.mrb[1].mxu1 }
  0xdd   :  { %v496_v58 = vadd.f32 %v188_v56, %v90_v19  ;;  %v498_v59 = vadd.f32 %v200_v57, %v100_v18 }
  0xde   :  { %v209_v60 = vand.u32 2147483647, %v492_v54  ;;  %v213_v61 = vand.u32 2147483647, %v494_v55 }
  0xdf   :  { %v210_v62 = vand.u32 2147483647, %v496_v58  ;;  %v214_v63 = vand.u32 2147483647, %v498_v59  ;;  %v192_v0 = vpop.f32.mrb[2].mxu0  ;;  %v204_v1 = vpop.f32.mrb[2].mxu1 }
  0xe0   :  { %v217_v2 = vmul.f32 -2.0, %v209_v60  ;;  %v221_v3 = vmul.f32 -2.0, %v213_v61  ;;  %v508_v4 = vadd.f32 %v192_v0, %v95_v21  ;;  %v510_v5 = vadd.f32 %v204_v1, %v105_v20  ;;  %v194_v6 = vpop.f32.mrb[3].mxu0  ;;  %v206_v7 = vpop.f32.mrb[3].mxu1 }
  0xe1   :  { %v218_v8 = vmul.f32 -2.0, %v210_v62  ;;  %v222_v9 = vmul.f32 -2.0, %v214_v63  ;;  %v516_v10 = vadd.f32 %v194_v6, %v95_v21  ;;  %v518_v11 = vadd.f32 %v206_v7, %v105_v20 }
  0xe2   :  { %v225_v12 = vmul.f32 1.442695, %v217_v2  ;;  %v233_v13 = vmul.f32 1.442695, %v221_v3  ;;  %v211_v14 = vand.u32 2147483647, %v508_v4 }
  0xe3   :  { %v227_v15 = vmul.f32 1.442695, %v218_v8  ;;  %v235_v16 = vmul.f32 1.442695, %v222_v9  ;;  %v215_v17 = vand.u32 2147483647, %v510_v5 }
  0xe4   :  { %351 = vpow2.f32 %v225_v12  ;;  %v219_v18 = vmul.f32 -2.0, %v211_v14  ;;  %v212_v19 = vand.u32 2147483647, %v516_v10  ;;  %v216_v22 = vand.u32 2147483647, %v518_v11 }
  0xe5   :  { %353 = vpow2.f32 %v233_v13  ;;  %v223_v21 = vmul.f32 -2.0, %v215_v17 }
  0xe6   :  { %355 = vpow2.f32 %v227_v15  ;;  %v229_v20 = vmul.f32 1.442695, %v219_v18  ;;  %v220_v23 = vmul.f32 -2.0, %v212_v19  ;;  %v224_v24 = vmul.f32 -2.0, %v216_v22 }
  0xe7   :  { %357 = vpow2.f32 %v235_v16  ;;  %v237_v25 = vmul.f32 1.442695, %v223_v21 }
  0xe8   :  { %359 = vpow2.f32 %v229_v20  ;;  %v231_v26 = vmul.f32 1.442695, %v220_v23  ;;  %v239_v27 = vmul.f32 1.442695, %v224_v24 }
  0xe9   :  { %361 = vpow2.f32 %v237_v25 }
  0xea   :  { %363 = vpow2.f32 %v231_v26 }
  0xeb   :  { %365 = vpow2.f32 %v239_v27 }
  0xee   :  { %v352_v28 = vpop.eup %351 }
  0xef   :  { %v354_v29 = vpop.eup %353  ;;  %v241_v30 = vadd.f32 1.0, %v352_v28 }
  0xf0   :  { %v356_v31 = vpop.eup %355  ;;  %v245_v32 = vadd.f32 1.0, %v354_v29 }
  0xf1   :  { %v358_v33 = vpop.eup %357  ;;  %367 = vlog2.f32 %v241_v30  ;;  %v242_v34 = vadd.f32 1.0, %v356_v31 }
  0xf2   :  { %v360_v35 = vpop.eup %359  ;;  %369 = vlog2.f32 %v245_v32  ;;  %v246_v36 = vadd.f32 1.0, %v358_v33 }
  0xf3   :  { %v362_v37 = vpop.eup %361  ;;  %371 = vlog2.f32 %v242_v34  ;;  %v243_v38 = vadd.f32 1.0, %v360_v35 }
  0xf4   :  { %v364_v39 = vpop.eup %363  ;;  %373 = vlog2.f32 %v246_v36  ;;  %v247_v40 = vadd.f32 1.0, %v362_v37 }
  0xf5   :  { %v366_v41 = vpop.eup %365  ;;  %375 = vlog2.f32 %v243_v38  ;;  %v244_v42 = vadd.f32 1.0, %v364_v39 }
  0xf6   :  { %377 = vlog2.f32 %v247_v40  ;;  %v248_v43 = vadd.f32 1.0, %v366_v41 }
  0xf7   :  { %379 = vlog2.f32 %v244_v42 }
  0xf8   :  { %381 = vlog2.f32 %v248_v43 }
  0xfb   :  { %v368_v44 = vpop.eup %367 }
  0xfc   :  { %v370_v45 = vpop.eup %369  ;;  %v250_v48 = vmul.f32 0.6931472, %v368_v44 }
  0xfd   :  { %v372_v46 = vpop.eup %371  ;;  %v258_v52 = vmul.f32 0.6931472, %v370_v45 }
  0xfe   :  { %v374_v49 = vpop.eup %373  ;;  %v252_v56 = vmul.f32 0.6931472, %v372_v46  ;;  %v265_v1 = vadd.f32 %v250_v48, %v209_v60 }
  0xff   :  { %v376_v51 = vpop.eup %375  ;;  %v260_v3 = vmul.f32 0.6931472, %v374_v49  ;;  %v269_v8 = vadd.f32 %v258_v52, %v213_v61 }
 0x100   :  { %v378_v53 = vpop.eup %377  ;;  %v254_v57 = vmul.f32 0.6931472, %v376_v51  ;;  %v266_v9 = vadd.f32 %v252_v56, %v210_v62 }
 0x101   :  { %v380_v0 = vpop.eup %379  ;;  %v262_v6 = vmul.f32 0.6931472, %v378_v53  ;;  %v270_v15 = vadd.f32 %v260_v3, %v214_v63 }
 0x102   :  { %v382_v2 = vpop.eup %381  ;;  %v267_v4 = vadd.f32 %v254_v57, %v211_v14  ;;  %v256_v7 = vmul.f32 0.6931472, %v380_v0 }
 0x103   :  { %v264_v13 = vmul.f32 0.6931472, %v382_v2  ;;  %v271_v54 = vadd.f32 %v262_v6, %v215_v17 }
 0x104   :  { %v274_v10 = vadd.f32 %v267_v4, %v265_v1  ;;  %v268_v12 = vadd.f32 %v256_v7, %v212_v19 }
 0x105   :  { %v272_v18 = vadd.f32 %v264_v13, %v216_v22  ;;  %v273_v22 = vld [vmem:[#allocation2] sm:$0x3] }
 0x106   :  { %v275_v60 = vadd.f32 %v274_v10, %v269_v8  ;;  %v283_v16 = vadd.f32 %v268_v12, %v266_v9 }
 0x108   :  { %v276_v14 = vadd.f32 %v275_v60, %v271_v54  ;;  %v284_v55 = vadd.f32 %v283_v16, %v270_v15 }
 0x10a   :  { %v277_v61 = vrot.slane %v276_v14, 4  ;;  %v285_v21 = vadd.f32 %v284_v55, %v272_v18 }
 0x10c   :  { %v278_v58 = vadd.f32 %v277_v61, %v276_v14  ;;  %v286_v62 = vrot.slane %v285_v21, 4 }
 0x10e   :  { %v279_v20 = vrot.slane %v278_v58, 2  ;;  %v287_v19 = vadd.f32 %v286_v62, %v285_v21 }
 0x110   :  { %v280_v23 = vadd.f32 %v279_v20, %v278_v58  ;;  %v288_v24 = vrot.slane %v287_v19, 2 }
 0x112   :  { %v281_v59 = vrot.slane %v280_v23, 1  ;;  %v289_v63 = vadd.f32 %v288_v24, %v287_v19 }
 0x114   :  { %v282_v25 = vadd.f32 %v281_v59, %v280_v23  ;;  %v290_v5 = vrot.slane %v289_v63, 1 }
 0x116   :  { %v291_v17 = vadd.f32 %v290_v5, %v289_v63 }
 0x118   :  { %v294_v26 = vcombine.low %v282_v25, %v291_v17 }
 0x11a   :  { %v301_v27 = vrot.slane %v294_v26, %v482_v47 }
 0x11c   :  { %v308_v11 = vrot.slane %v301_v27, %v482_v47 }
 0x11e   :  { %v310_v28 = vadd.f32 %v308_v11, %v273_v22 }
 0x120   :  { %315 = vst.msk [vmem:[#allocation2] sm:$0x3] %vm485_vm1, %v310_v28 }
 0x127   :  { %v319_v29 = vld [vmem:[#allocation2] sm:$0x3] }
 0x128   :  { %320 = vst.msk [vmem:[#allocation3] sm:$0x3] %vm485_vm1, %v319_v29 }
 0x129   :  { %394 = shalt.err (!%p391_p4)
}
 0x12a   :  { %s395_s18 = scalar_lea.hbm %s562_s4, 32 }
 0x12b   :  { %p396_p5 = scmp.ne.s32.totalorder %s562_s4, %s395_s18  ;;  %p399_p6 = scmp.lt.u32.totalorder %s395_s18, %s562_s4 }
 0x12d   :  { %p401_p7 = pnand %p399_p6, %p396_p5 }
 0x12f   :  { %404 = shalt.err (!%p401_p7)
}
 0x130   :  { %330 = dma.vmem_to_hbm [thread:$0]  %s328_s2, 32, %s562_s4, [#allocation4]  }
 0x131   :  { %405 = dma.done.wait [#allocation4], 32  }
 0x132   :  { %406 = vsyncadd [#allocation4], 4294967264 }
 0x133   :  { %334 = vsyncpa [#allocation4], 1 }

</bundles_post_ra>
